<compile_context>
chip_gen: v7x
topology: tpu7x:2x2x1
jax: 0.10.0
libtpu: 0.0.40
codegen_flags: <defaults>
</compile_context>

<pallas_src>
import jax
import jax.numpy as jnp
from jax.experimental import pallas as pl
from jax.experimental.pallas import tpu as pltpu


def _freqconv_kernel(x_ref, w_ref, b_ref, o_ref):
    """One grid step: a tile of B_TILE batch items.

    x_ref: [B_TILE, C_in, K]        f32
    w_ref: [C_out, KSIZE * C_in]    bf16, contraction packed as (tap, c_in)
    b_ref: [C_out, 1]               f32
    o_ref: [C_out, B_TILE * K]      f32   (lane-dense output slab)
    """
    b_tile, c_in, k = x_ref.shape
    ksize = w_ref.shape[1] // c_in
    pad = (ksize - 1) // 2
    ntot = b_tile * k

    # Fold the batch tile onto the lane axis: [C_in, B_TILE*K]
    # (item i occupies lanes [i*K, (i+1)*K)).
    x_all = jnp.concatenate([x_ref[i] for i in range(b_tile)], axis=-1)

    # Local (within-item) lane position, hoisted once and reused by every tap:
    # masks the conv halo so shifted taps see zeros outside each item's [0, K)
    # range and never read across batch-item boundaries.
    lane = jax.lax.broadcasted_iota(jnp.int32, (1, ntot), 1) % k

    # im2col: KSIZE shifted copies stacked on the contraction (sublane) axis.
    taps = []
    for t in range(ksize):
        s = pad - t                       # output[k] uses input[k - s]
        if s == 0:
            taps.append(x_all)
        else:
            shifted = pltpu.roll(x_all, shift=s % ntot, axis=1)
            mask = (lane >= s) if s > 0 else (lane < k + s)
            taps.append(jnp.where(mask, shifted, 0.0))
    rhs = jnp.concatenate(taps, axis=0)   # [KSIZE*C_in, B_TILE*K]

    # Single fused MXU matmul (bf16 inputs, f32 accumulation) + bias.
    acc = jnp.dot(w_ref[...], rhs.astype(jnp.bfloat16),
                  preferred_element_type=jnp.float32)
    o_ref[...] = (acc + b_ref[...]).astype(o_ref.dtype)


@jax.jit
def freq_conv_forward(x, w, b):
    """FreqConv forward.  x: [B, C_in, K], w: [C_out, C_in, KSIZE], b: [C_out]."""
    B, c_in, K = x.shape
    c_out, _, ksize = w.shape
    assert ksize % 2 == 1, "odd kernel size expected ('same'-length output)"

    # Pack weights as [C_out, KSIZE*C_in] with contraction order (tap, c_in),
    # matching the in-kernel im2col; bf16 feeds the MXU at full rate on
    # v6e/v7x (and is native on v5e too), accumulation stays f32.
    w_packed = jnp.transpose(w, (0, 2, 1)).reshape(c_out, ksize * c_in)
    w_packed = w_packed.astype(jnp.bfloat16)
    b_col = b.reshape(c_out, 1).astype(jnp.float32)

    # Batch tile: largest divisor of B such that the folded RHS / output slab
    # targets >= 512 lanes per grid step (lane-dense stores, fewer grid steps).
    target = max(1, pl.cdiv(512, K))
    b_tile = max(d for d in range(1, B + 1) if B % d == 0 and d <= target)
    if (B // b_tile) > 1 and (b_tile * K) % 128 != 0:
        b_tile = B  # keep non-final output blocks 128-lane aligned
    # TODO(synk): for very large K, tile the frequency axis with a PAD-wide
    # halo and re-budget VMEM (64 MiB on v7x) via CompilerParams(vmem_limit_bytes=...).

    out_flat = pl.pallas_call(
        _freqconv_kernel,
        out_shape=jax.ShapeDtypeStruct((c_out, B * K), jnp.float32),
        grid_spec=pltpu.PrefetchScalarGridSpec(
            num_scalar_prefetch=0,
            grid=(B // b_tile,),
            in_specs=[
                pl.BlockSpec((b_tile, c_in, K), lambda i: (i, 0, 0)),
                # Weight / bias index_maps are grid-invariant, so Pallas only
                # DMAs these tiny blocks once across the whole grid.
                pl.BlockSpec((c_out, ksize * c_in), lambda i: (0, 0)),
                pl.BlockSpec((c_out, 1), lambda i: (0, 0)),
            ],
            out_specs=pl.BlockSpec((c_out, b_tile * K), lambda i: (0, i)),
        ),
        compiler_params=pltpu.CompilerParams(
            dimension_semantics=("parallel",)),
    )(x, w_packed, b_col)

    # Layout plumbing only: lane-dense [C_out, B*K] slab -> [B, C_out, K].
    return out_flat.reshape(c_out, B, K).transpose(1, 0, 2)


def freq_conv_reference(x, w, b):
    """Pure-JAX f32 reference with nn.Conv1d(padding=(k-1)//2) semantics."""
    ksize = w.shape[-1]
    pad = (ksize - 1) // 2
    K = x.shape[-1]
    xp = jnp.pad(x, ((0, 0), (0, 0), (pad, pad)))
    out = jnp.broadcast_to(b[None, :, None],
                           (x.shape[0], w.shape[0], K)).astype(jnp.float32)
    for t in range(ksize):
        out = out + jnp.einsum("oc,bck->bok", w[:, :, t], xp[:, :, t:t + K])
    return out


if __name__ == "__main__":
    # Small shapes consistent with the module: [B, C_in, K] T-F features.
    B, C_IN, C_OUT, KSIZE, K = 2, 4, 8, 5, 16
    key = jax.random.PRNGKey(0)
    kx, kw, kb = jax.random.split(key, 3)

    x = jax.random.normal(kx, (B, C_IN, K), jnp.float32)
    bound = 1.0 / (C_IN * KSIZE) ** 0.5          # PyTorch Conv1d default init
    w = jax.random.uniform(kw, (C_OUT, C_IN, KSIZE), jnp.float32, -bound, bound)
    b = jax.random.uniform(kb, (C_OUT,), jnp.float32, -bound, bound)

    out = freq_conv_forward(x, w, b)
    jax.block_until_ready(out)
    assert out.shape == (B, C_OUT, K), out.shape

    ref = freq_conv_reference(x, w, b)
    max_err = float(jnp.max(jnp.abs(out - ref)))
    # bf16 matmul inputs with f32 accumulation -> loose-ish tolerance.
    assert jnp.allclose(out, ref, rtol=2e-2, atol=2e-2), max_err

    print("KERNEL_OK")
</pallas_src>

<mosaic_0001>
module attributes {stable_mosaic.version = 11 : i64} {
  func.func @_freqconv_kernel(%arg0: i32, %arg1: memref<2x4x16xf32, #tpu.memory_space<vmem>>, %arg2: memref<8x20xbf16, #tpu.memory_space<vmem>>, %arg3: memref<8x1xf32, #tpu.memory_space<vmem>>, %arg4: memref<8x32xf32, #tpu.memory_space<vmem>>) attributes {dimension_semantics = [#tpu.dimension_semantics<parallel>], iteration_bounds = array<i64: 1>, scalar_prefetch = 0 : i64, scratch_operands = 0 : i64, tpu.core_type = #tpu.core_type<tc>, window_params = [{transform_indices = @transform_0, window_bounds = array<i64: 2, 4, 16>}, {pipeline_mode = #tpu.pipeline_mode<synchronous>, transform_indices = @transform_1, window_bounds = array<i64: 8, 20>}, {pipeline_mode = #tpu.pipeline_mode<synchronous>, transform_indices = @transform_2, window_bounds = array<i64: 8, 1>}, {transform_indices = @transform_3, window_bounds = array<i64: 8, 32>}]} {
    %c0 = arith.constant 0 : index
    %c0_0 = arith.constant 0 : index
    %c0_1 = arith.constant 0 : index
    %0 = vector.load %arg1[%c0, %c0_0, %c0_1] : memref<2x4x16xf32, #tpu.memory_space<vmem>>, vector<1x4x16xf32>
    %1 = vector.shape_cast %0 : vector<1x4x16xf32> to vector<4x16xf32>
    %c1 = arith.constant 1 : index
    %c0_2 = arith.constant 0 : index
    %c0_3 = arith.constant 0 : index
    %2 = vector.load %arg1[%c1, %c0_2, %c0_3] : memref<2x4x16xf32, #tpu.memory_space<vmem>>, vector<1x4x16xf32>
    %3 = vector.shape_cast %2 : vector<1x4x16xf32> to vector<4x16xf32>
    %4 = tpu.concatenate %1, %3 in 1 : vector<4x16xf32>, vector<4x16xf32> -> vector<4x32xf32>
    %5 = tpu.iota {dimensions = array<i32: 1>} : vector<1x32xi32>
    %c16_i32 = arith.constant 16 : i32
    %c0_i32 = arith.constant 0 : i32
    %6 = arith.cmpi eq, %c16_i32, %c0_i32 : i32
    %c1_i32 = arith.constant 1 : i32
    %7 = arith.select %6, %c1_i32, %c16_i32 : i32
    %8 = vector.broadcast %7 : i32 to vector<1x32xi32>
    %9 = arith.remsi %5, %8 : vector<1x32xi32>
    %c0_i32_4 = arith.constant 0 : i32
    %10 = vector.broadcast %c0_i32_4 : i32 to vector<1x32xi32>
    %11 = arith.cmpi ne, %9, %10 : vector<1x32xi32>
    %c0_i32_5 = arith.constant 0 : i32
    %12 = vector.broadcast %c0_i32_5 : i32 to vector<1x32xi32>
    %13 = arith.cmpi slt, %9, %12 : vector<1x32xi32>
    %c0_i32_6 = arith.constant 0 : i32
    %14 = arith.cmpi slt, %7, %c0_i32_6 : i32
    %15 = vector.broadcast %14 : i1 to vector<1x32xi1>
    %16 = vector.broadcast %15 : vector<1x32xi1> to vector<1x32xi1>
    %17 = arith.xori %13, %16 : vector<1x32xi1>
    %18 = arith.andi %17, %11 : vector<1x32xi1>
    %19 = vector.broadcast %7 : i32 to vector<1x32xi32>
    %20 = arith.addi %9, %19 : vector<1x32xi32>
    %21 = arith.select %18, %20, %9 : vector<1x32xi1>, vector<1x32xi32>
    %c2_i32 = arith.constant 2 : i32
    %22 = tpu.dynamic_rotate %4 by %c2_i32 dim 1 : vector<4x32xf32>, i32 -> vector<4x32xf32>
    %c2_i32_7 = arith.constant 2 : i32
    %23 = vector.broadcast %c2_i32_7 : i32 to vector<1x32xi32>
    %24 = arith.cmpi sge, %21, %23 : vector<1x32xi32>
    %cst = arith.constant 0.000000e+00 : f32
    %25 = vector.shape_cast %24 : vector<1x32xi1> to vector<1x32xi1>
    %26 = vector.broadcast %25 : vector<1x32xi1> to vector<4x32xi1>
    %27 = vector.broadcast %cst : f32 to vector<4x32xf32>
    %28 = arith.select %26, %22, %27 : vector<4x32xi1>, vector<4x32xf32>
    %c1_i32_8 = arith.constant 1 : i32
    %29 = tpu.dynamic_rotate %4 by %c1_i32_8 dim 1 : vector<4x32xf32>, i32 -> vector<4x32xf32>
    %c1_i32_9 = arith.constant 1 : i32
    %30 = vector.broadcast %c1_i32_9 : i32 to vector<1x32xi32>
    %31 = arith.cmpi sge, %21, %30 : vector<1x32xi32>
    %cst_10 = arith.constant 0.000000e+00 : f32
    %32 = vector.shape_cast %31 : vector<1x32xi1> to vector<1x32xi1>
    %33 = vector.broadcast %32 : vector<1x32xi1> to vector<4x32xi1>
    %34 = vector.broadcast %cst_10 : f32 to vector<4x32xf32>
    %35 = arith.select %33, %29, %34 : vector<4x32xi1>, vector<4x32xf32>
    %c31_i32 = arith.constant 31 : i32
    %36 = tpu.dynamic_rotate %4 by %c31_i32 dim 1 : vector<4x32xf32>, i32 -> vector<4x32xf32>
    %c15_i32 = arith.constant 15 : i32
    %37 = vector.broadcast %c15_i32 : i32 to vector<1x32xi32>
    %38 = arith.cmpi slt, %21, %37 : vector<1x32xi32>
    %cst_11 = arith.constant 0.000000e+00 : f32
    %39 = vector.shape_cast %38 : vector<1x32xi1> to vector<1x32xi1>
    %40 = vector.broadcast %39 : vector<1x32xi1> to vector<4x32xi1>
    %41 = vector.broadcast %cst_11 : f32 to vector<4x32xf32>
    %42 = arith.select %40, %36, %41 : vector<4x32xi1>, vector<4x32xf32>
    %c30_i32 = arith.constant 30 : i32
    %43 = tpu.dynamic_rotate %4 by %c30_i32 dim 1 : vector<4x32xf32>, i32 -> vector<4x32xf32>
    %c14_i32 = arith.constant 14 : i32
    %44 = vector.broadcast %c14_i32 : i32 to vector<1x32xi32>
    %45 = arith.cmpi slt, %21, %44 : vector<1x32xi32>
    %cst_12 = arith.constant 0.000000e+00 : f32
    %46 = vector.shape_cast %45 : vector<1x32xi1> to vector<1x32xi1>
    %47 = vector.broadcast %46 : vector<1x32xi1> to vector<4x32xi1>
    %48 = vector.broadcast %cst_12 : f32 to vector<4x32xf32>
    %49 = arith.select %47, %43, %48 : vector<4x32xi1>, vector<4x32xf32>
    %50 = tpu.concatenate %28, %35, %4, %42, %49 in 0 : vector<4x32xf32>, vector<4x32xf32>, vector<4x32xf32>, vector<4x32xf32>, vector<4x32xf32> -> vector<20x32xf32>
    %c0_13 = arith.constant 0 : index
    %c0_14 = arith.constant 0 : index
    %51 = vector.load %arg2[%c0_13, %c0_14] : memref<8x20xbf16, #tpu.memory_space<vmem>>, vector<8x20xbf16>
    %52 = arith.truncf %50 : vector<20x32xf32> to vector<20x32xbf16>
    %cst_15 = arith.constant dense<0.000000e+00> : vector<8x32xf32>
    %53 = tpu.matmul %51, %52, %cst_15 {dimension_numbers = #tpu.dot_dimension_numbers<[1], [0], [0], [1], [0, 0, 1, 1], [], []>} : vector<8x20xbf16>, vector<20x32xbf16>, vector<8x32xf32> -> vector<8x32xf32>
    %c0_16 = arith.constant 0 : index
    %c0_17 = arith.constant 0 : index
    %54 = vector.load %arg3[%c0_16, %c0_17] : memref<8x1xf32, #tpu.memory_space<vmem>>, vector<8x1xf32>
    %55 = vector.broadcast %54 : vector<8x1xf32> to vector<8x32xf32>
    %56 = arith.addf %53, %55 : vector<8x32xf32>
    %c0_18 = arith.constant 0 : index
    %c0_19 = arith.constant 0 : index
    %57 = vector.load %arg4[%c0_18, %c0_19] : memref<8x32xf32, #tpu.memory_space<vmem>>, vector<8x32xf32>
    tpu.vector_store %arg4[%c0_18, %c0_19], %56 {strides = array<i32>} : memref<8x32xf32, #tpu.memory_space<vmem>>, vector<8x32xf32>,
    return
  }
  func.func @transform_0(%arg0: i32) -> (i32, i32, i32) {
    %c0_i32 = arith.constant 0 : i32
    %c0_i32_0 = arith.constant 0 : i32
    %c0_i32_1 = arith.constant 0 : i32
    return %arg0, %c0_i32, %c0_i32_0 : i32, i32, i32
  }
  func.func @transform_1(%arg0: i32) -> (i32, i32) {
    %c0_i32 = arith.constant 0 : i32
    %c0_i32_0 = arith.constant 0 : i32
    %c0_i32_1 = arith.constant 0 : i32
    return %c0_i32, %c0_i32_0 : i32, i32
  }
  func.func @transform_2(%arg0: i32) -> (i32, i32) {
    %c0_i32 = arith.constant 0 : i32
    %c0_i32_0 = arith.constant 0 : i32
    %c0_i32_1 = arith.constant 0 : i32
    return %c0_i32, %c0_i32_0 : i32, i32
  }
  func.func @transform_3(%arg0: i32) -> (i32, i32) {
    %c0_i32 = arith.constant 0 : i32
    %c0_i32_0 = arith.constant 0 : i32
    return %c0_i32, %arg0 : i32, i32
  }
}

</mosaic_0001>

<bundles_post_ra>
// kernel: freq_conv_forward.1
= control target key start
LH: loop header
LB: loop body
LE: loop exit
PB: predicated region body
PF: predicated region fallthrough
CT: control target
= control target key end

     0   :  { %s170_s14 = smov 16   ;;  %vm22_vm0 = vcmask 130048   ;;  %s171_s17 = smov 32   ;;  %vm38_vm1 = vcmask 1047808   ;;  %v172_v6 = vmov 0.0   ;;  %vm175_vm2 = vmmov 0   ;;  %s214_s0 = inlined_call_operand.vmem [shape: f32[2,4,16], index: 0, kind: input, shape index: {}]   ;;  %s215_s2 = inlined_call_operand.vmem [shape: f32[8,1], index: 2, kind: input, shape index: {}]   ;;  %s216_s1 = inlined_call_operand.vmem [shape: bf16[8,20], index: 1, kind: input, shape index: {}]   ;;  %s217_s3 = inlined_call_operand.vmem [shape: f32[8,32], index: 3, kind: output, shape index: {}]  }
   0x1   :  { %v146_v0 = vld [vmem:[%s214_s0 + $0x4] sm:$0xf]  ;;  %v15_v1 = vld [vmem:[%s214_s0] sm:$0xf]  ;;  %151 = vmatprep.subr.bf16.mxu0 %v172_v6  ;;  %s173_s18 = smov 127   ;;  %s174_s19 = smov 97   ;;  %155 = vmatprep.mubr.msk.bf16.mxu0 %vm175_vm2, %v172_v6  ;;  %v24_v11 = vlaneseq }
   0x2   :  { %19 = vrot.lane.b32.xlu0 %v146_v0, %s170_s14  ;;  %v176_v9 = vmov 0   ;;  %s177_s0 = smov 126   ;;  %s178_s20 = smov 98   ;;  %v86_v10 = vld [vmem:[%s215_s2] sm:$0xff]  ;;  %vm80_vm7 = vcmask 1043456   ;;  %vm96_vm8 = vcmask 1041408  }
   0x3   :  { %168 = vset.pattern.permute.xlu1 %v176_v9  ;;  %169 = vset.pattern.permute.xlu0 %v176_v9  ;;  %v25_v12 = vand.u32 127, %v24_v11  ;;  %v83_v29 = vld [vmem:[%s216_s1] sm:$0xf]  ;;  %vm92_vm9 = vcmask 162816   ;;  %vm140_vm10 = vcmask 261120  }
   0x5   :  { %v30_v13 = vand.u32 15, %v25_v12 }
   0x7   :  { %vm60_vm3 = vcmp.lt.s32.totalorder %v30_v13, 15  ;;  %vm53_vm4 = vcmp.ge.s32.totalorder %v30_v13, 1  ;;  %vm67_vm5 = vcmp.lt.s32.totalorder %v30_v13, 14  ;;  %vm45_vm6 = vcmp.ge.s32.totalorder %v30_v13, 2 }
  0x74   :  { %v20_v2 = vpop.permute.xlu0 %19 }
  0x75   :  { %v23_v3 = vsel %vm22_vm0, %v15_v1, %v20_v2 }
  0x76   :  { %39 = vrot.lane.b32.xlu0 %v23_v3, %s171_s17 }
  0xe8   :  { %v40_v4 = vpop.permute.xlu0 %39 }
  0xe9   :  { %v41_v5 = vsel %vm38_vm1, %v40_v4, %v23_v3 }
  0xea   :  { %42 = vrot.lane.b32.xlu1 %v41_v5, %s171_s17 }
 0x15c   :  { %v43_v7 = vpop.permute.xlu1 %42 }
 0x15d   :  { %v44_v8 = vsel %vm38_vm1, %v43_v7, %v23_v3 }
 0x15e   :  { %63 = vrot.lane.b32.xlu0 %v44_v8, %s173_s18  ;;  %56 = vrot.lane.b32.xlu1 %v44_v8, %s174_s19 }
 0x162   :  { %70 = vrot.lane.b32.xlu0 %v44_v8, %s177_s0  ;;  %49 = vrot.lane.b32.xlu1 %v44_v8, %s178_s20 }
 0x166   :  { %89 = vperm.xlu1 %168, %v86_v10  }
 0x1d0   :  { %v64_v14 = vpop.permute.xlu0 %63  ;;  %v57_v15 = vpop.permute.xlu1 %56 }
 0x1d1   :  { %v66_v16 = vsel %vm60_vm3, %v64_v14, 0.0  ;;  %v59_v17 = vsel %vm53_vm4, %v57_v15, 0.0 }
 0x1d2   :  { %v78_v18 = vrot.slane %v66_v16, 4  ;;  %v75_v19 = vrot.slane %v59_v17, 4 }
 0x1d4   :  { %v71_v20 = vpop.permute.xlu0 %70  ;;  %v50_v21 = vpop.permute.xlu1 %49  ;;  %v82_v25 = vsel %vm80_vm7, %v23_v3, %v78_v18 }
 0x1d5   :  { %v73_v22 = vsel %vm67_vm5, %v71_v20, 0.0  ;;  %v52_v23 = vsel %vm45_vm6, %v50_v21, 0.0 }
 0x1d6   :  { %v81_v24 = vsel %vm80_vm7, %v52_v23, %v75_v19  ;;  %v85_v27 = vpack.c.bf16 %v73_v22, %v73_v22 }
 0x1d7   :  { %v84_v26 = vpack.c.bf16 %v82_v25, %v81_v24 }
 0x1d8   :  { %v98_v28 = vsel %vm96_vm8, %v85_v27, 0 }
 0x1d9   :  { %152 = vmatpush3.bf16.msra.mxu0 %v84_v26 }
 0x1da   :  { %153 = vmatprep.subr.bf16.mxu0 %v172_v6 }
 0x1dd   :  { %154 = vmatpush3.bf16.msra.mxu0 %v98_v28 }
 0x1e0   :  { %156 = vmatmul.mubr.msk.bf16.vlgmr.msra.gmra.mrb[0].mxu0 %vm92_vm9, %v83_v29 }
 0x1e5   :  { %v90_v30 = vpop.permute.xlu1 %89 }
 0x2b3   :  { %v134_v31 = vpop.f32.mrb[0].mxu0 }
 0x2b4   :  { %v135_v32 = vadd.f32 %v134_v31, %v90_v30  ;;  %v157_v33 = vpop.f32.mrb[1].mxu0 }
 0x2b5   :  { %v137_v34 = vpop.f32.mrb[2].mxu0 }
 0x2b6   :  { %141 = vst.msk [vmem:[%s217_s3] sm:$0xff] %vm140_vm10, %v135_v32  ;;  %v158_v35 = vpop.f32.mrb[3].mxu0 }

</bundles_post_ra>
